<compile_context>
chip_gen: v7x
topology: tpu7x:2x2x1
jax: 0.10.0
libtpu: 0.0.40
codegen_flags: <defaults>
</compile_context>

<pallas_src>
import jax
import jax.numpy as jnp
from jax.experimental import pallas as pl
from jax.experimental.pallas import tpu as pltpu


def patch_embed_kernel(p_ref, w_ref, pos_ref, out_ref):
    # p_ref:   (bb, N+1, K) bf16   -- row 0 of each image is a zero "cls placeholder" row
    # w_ref:   (K, E)       bf16   -- grid-invariant (DMA'd once)
    # pos_ref: (N+1, E)     f32    -- row 0 = cls + pos[0]; rows 1.. = pos[1:] + conv_bias
    # out_ref: (bb, N+1, E) f32
    y = jnp.einsum("bnk,ke->bne", p_ref[...], w_ref[...],
                   preferred_element_type=jnp.float32)          # MXU, f32 accumulate
    out_ref[...] = (y + pos_ref[...]).astype(out_ref.dtype)     # f32 add, aligned store


def _pick_batch_block(B, max_bb=8):
    """Largest divisor of B that is <= max_bb (amortizes per-grid-step overhead)."""
    bb = 1
    for cand in range(1, min(B, max_bb) + 1):
        if B % cand == 0:
            bb = cand
    return bb


def patch_embedding_forward(x, conv_w, conv_b, cls_token, pos_embed, patch_size):
    """x: (B, C, H, W) f32. conv_w: (E, C, P, P). conv_b: (E,).
    cls_token: (1, 1, E). pos_embed: (1, N+1, E). Returns (B, N+1, E) f32."""
    B, C, H, W = x.shape
    P = patch_size
    E = conv_w.shape[0]
    Hp, Wp = H // P, W // P
    N = Hp * Wp
    K = C * P * P

    # --- wrapper-side layout / folding (one fused XLA pass, bf16 output) ---
    # (B, C, Hp, P, Wp, P) -> (B, Hp, Wp, C, P, P) -> (B, N, K); K order = (c, ph, pw)
    patches = x.reshape(B, C, Hp, P, Wp, P).transpose(0, 2, 4, 1, 3, 5).reshape(B, N, K)
    # Prepend zero row (cls placeholder) so row 0 of the matmul output is 0; cast bf16.
    patches = jnp.pad(patches, ((0, 0), (1, 0), (0, 0))).astype(jnp.bfloat16)  # (B, N+1, K)

    w_mat = conv_w.reshape(E, K).T.astype(jnp.bfloat16)        # (K, E), order (c, ph, pw)

    pos = pos_embed.reshape(N + 1, E).astype(jnp.float32)
    pos_ext = jnp.concatenate(
        [cls_token.reshape(1, E) + pos[0:1],                   # row 0: cls + pos[0]
         pos[1:] + conv_b.reshape(1, E)],                      # rows 1..: pos + bias
        axis=0)                                                # (N+1, E) f32

    bb = _pick_batch_block(B)
    grid = (B // bb,)

    flops = 2 * B * (N + 1) * K * E
    bytes_accessed = (B * (N + 1) * K * 2      # patches (bf16)
                      + K * E * 2              # weight  (bf16)
                      + (N + 1) * E * 4        # pos_ext (f32)
                      + B * (N + 1) * E * 4)   # output  (f32)

    out = pl.pallas_call(
        patch_embed_kernel,
        out_shape=jax.ShapeDtypeStruct((B, N + 1, E), jnp.float32),
        grid_spec=pltpu.PrefetchScalarGridSpec(
            num_scalar_prefetch=0,
            grid=grid,
            in_specs=[
                pl.BlockSpec((bb, N + 1, K), lambda b: (b, 0, 0)),  # patches (bb images)
                pl.BlockSpec((K, E), lambda b: (0, 0)),             # weight (grid-invariant)
                pl.BlockSpec((N + 1, E), lambda b: (0, 0)),         # pos+bias/cls (invariant)
            ],
            out_specs=pl.BlockSpec((bb, N + 1, E), lambda b: (b, 0, 0)),
        ),
        compiler_params=pltpu.CompilerParams(
            dimension_semantics=("parallel",)),
        cost_estimate=pl.CostEstimate(
            flops=flops, transcendentals=0, bytes_accessed=bytes_accessed),
    )(patches, w_mat, pos_ext)
    return out


def _reference(x, conv_w, conv_b, cls_token, pos_embed, patch_size):
    """Pure-JAX reference mirroring the PyTorch forward (eval mode), f32 math."""
    B, C, H, W = x.shape
    P = patch_size
    E = conv_w.shape[0]
    y = jax.lax.conv_general_dilated(
        x, conv_w, window_strides=(P, P), padding="VALID",
        dimension_numbers=("NCHW", "OIHW", "NCHW"),
        precision=jax.lax.Precision.HIGHEST)                   # (B, E, Hp, Wp)
    y = y + conv_b.reshape(1, E, 1, 1)
    y = y.reshape(B, E, -1).transpose(0, 2, 1)                 # (B, N, E)
    cls = jnp.broadcast_to(cls_token, (B, 1, E))
    y = jnp.concatenate([cls, y], axis=1)
    return y + pos_embed


if __name__ == "__main__":
    # Small shapes consistent with the module:
    # batch=2, in_channels=4, image 16x16, patch_size=8 -> num_patches=4, embed_dim=32
    B, C, H, W = 2, 4, 16, 16
    P = 8
    E = 32
    N = (H // P) * (W // P)

    key = jax.random.PRNGKey(0)
    k_x, k_w, k_b, k_cls, k_pos = jax.random.split(key, 5)

    x = jax.random.normal(k_x, (B, C, H, W), dtype=jnp.float32)
    conv_w = jax.random.normal(k_w, (E, C, P, P), dtype=jnp.float32) * 0.02
    conv_b = jax.random.normal(k_b, (E,), dtype=jnp.float32) * 0.02
    cls_token = jax.random.normal(k_cls, (1, 1, E), dtype=jnp.float32)
    pos_embed = jax.random.normal(k_pos, (1, N + 1, E), dtype=jnp.float32)

    out = patch_embedding_forward(x, conv_w, conv_b, cls_token, pos_embed, P)
    out = jax.block_until_ready(out)

    ref = _reference(x, conv_w, conv_b, cls_token, pos_embed, P)
    assert out.shape == (B, N + 1, E)
    # bf16 operands (f32 accumulation) -> loosened tolerance vs the f32 reference.
    assert jnp.allclose(out, ref, atol=3e-2, rtol=3e-2), "mismatch vs reference"

    print("KERNEL_OK")
</pallas_src>

<mosaic_0001>
module attributes {stable_mosaic.version = 11 : i64} {
  func.func @patch_embed_kernel(%arg0: i32, %arg1: memref<2x5x256xbf16, #tpu.memory_space<vmem>>, %arg2: memref<256x32xbf16, #tpu.memory_space<vmem>>, %arg3: memref<5x32xf32, #tpu.memory_space<vmem>>, %arg4: memref<2x5x32xf32, #tpu.memory_space<vmem>>) attributes {dimension_semantics = [#tpu.dimension_semantics<parallel>], iteration_bounds = array<i64: 1>, scalar_prefetch = 0 : i64, scratch_operands = 0 : i64, tpu.core_type = #tpu.core_type<tc>, window_params = [{transform_indices = @transform_0, window_bounds = array<i64: 2, 5, 256>}, {pipeline_mode = #tpu.pipeline_mode<synchronous>, transform_indices = @transform_1, window_bounds = array<i64: 256, 32>}, {pipeline_mode = #tpu.pipeline_mode<synchronous>, transform_indices = @transform_2, window_bounds = array<i64: 5, 32>}, {transform_indices = @transform_3, window_bounds = array<i64: 2, 5, 32>}]} {
    %c0 = arith.constant 0 : index
    %c0_0 = arith.constant 0 : index
    %c0_1 = arith.constant 0 : index
    %0 = vector.load %arg1[%c0, %c0_0, %c0_1] : memref<2x5x256xbf16, #tpu.memory_space<vmem>>, vector<2x5x256xbf16>
    %c0_2 = arith.constant 0 : index
    %c0_3 = arith.constant 0 : index
    %1 = vector.load %arg2[%c0_2, %c0_3] : memref<256x32xbf16, #tpu.memory_space<vmem>>, vector<256x32xbf16>
    "tpu.trace_start"() <{level = 10 : i32, message = "bnk,ke->bne"}> : () -> ()
    %cst = arith.constant dense<0.000000e+00> : vector<2x5x32xf32>
    %2 = tpu.matmul %0, %1, %cst {dimension_numbers = #tpu.dot_dimension_numbers<[2], [0], [0, 1], [1], [0, 0, 0, 1, 1, 1], [], []>} : vector<2x5x256xbf16>, vector<256x32xbf16>, vector<2x5x32xf32> -> vector<2x5x32xf32>
    "tpu.trace_stop"() : () -> ()
    %c0_4 = arith.constant 0 : index
    %c0_5 = arith.constant 0 : index
    %3 = vector.load %arg3[%c0_4, %c0_5] : memref<5x32xf32, #tpu.memory_space<vmem>>, vector<5x32xf32>
    %4 = vector.shape_cast %3 : vector<5x32xf32> to vector<1x5x32xf32>
    %5 = vector.broadcast %4 : vector<1x5x32xf32> to vector<2x5x32xf32>
    %6 = arith.addf %2, %5 : vector<2x5x32xf32>
    %c0_6 = arith.constant 0 : index
    %c0_7 = arith.constant 0 : index
    %c0_8 = arith.constant 0 : index
    %7 = vector.load %arg4[%c0_6, %c0_7, %c0_8] : memref<2x5x32xf32, #tpu.memory_space<vmem>>, vector<2x5x32xf32>
    tpu.vector_store %arg4[%c0_6, %c0_7, %c0_8], %6 {strides = array<i32>} : memref<2x5x32xf32, #tpu.memory_space<vmem>>, vector<2x5x32xf32>,
    return
  }
  func.func @transform_0(%arg0: i32) -> (i32, i32, i32) {
    %c0_i32 = arith.constant 0 : i32
    %c0_i32_0 = arith.constant 0 : i32
    %c0_i32_1 = arith.constant 0 : i32
    return %arg0, %c0_i32, %c0_i32_0 : i32, i32, i32
  }
  func.func @transform_1(%arg0: i32) -> (i32, i32) {
    %c0_i32 = arith.constant 0 : i32
    %c0_i32_0 = arith.constant 0 : i32
    %c0_i32_1 = arith.constant 0 : i32
    return %c0_i32, %c0_i32_0 : i32, i32
  }
  func.func @transform_2(%arg0: i32) -> (i32, i32) {
    %c0_i32 = arith.constant 0 : i32
    %c0_i32_0 = arith.constant 0 : i32
    %c0_i32_1 = arith.constant 0 : i32
    return %c0_i32, %c0_i32_0 : i32, i32
  }
  func.func @transform_3(%arg0: i32) -> (i32, i32, i32) {
    %c0_i32 = arith.constant 0 : i32
    %c0_i32_0 = arith.constant 0 : i32
    %c0_i32_1 = arith.constant 0 : i32
    return %arg0, %c0_i32, %c0_i32_0 : i32, i32, i32
  }
}

</mosaic_0001>

<bundles_post_ra>
// kernel: tpu_custom_call.1
= control target key start
LH: loop header
LB: loop body
LE: loop exit
PB: predicated region body
PF: predicated region fallthrough
CT: control target
= control target key end

     0   :  { %v637_v5 = vmov 1966171168   ;;  %v63_v7 = vlaneseq  ;;  %vm567_vm0 = vcmask 258048   ;;  %s766_s1 = inlined_call_operand.vmem [shape: bf16[256,32], index: 1, kind: input, shape index: {}]   ;;  %s767_s0 = inlined_call_operand.vmem [shape: bf16[2,5,256], index: 0, kind: input, shape index: {}]   ;;  %s768_s2 = inlined_call_operand.vmem [shape: f32[5,32], index: 2, kind: input, shape index: {}]   ;;  %s769_s3 = inlined_call_operand.vmem [shape: f32[2,5,32], index: 3, kind: output, shape index: {}]  }
   0x1   :  { %v620_v0 = vld [vmem:[%s766_s1 + $0x40] sm:$0xff]   ;;  %v622_v2 = vld [vmem:[%s766_s1 + $0x48] sm:$0xff]   ;;  %v624_v4 = vld [vmem:[%s766_s1 + $0x50] sm:$0xff]   ;;  %v61_v6 = vunpack.c.l.s4 %v637_v5 }
   0x2   :  { %v621_v1 = vld [vmem:[%s766_s1] sm:$0xff]   ;;  %597 = vmatprep.subr.bf16.mxu0 %v620_v0  ;;  %v623_v3 = vld [vmem:[%s766_s1 + $0x8] sm:$0xff]   ;;  %v625_v8 = vld [vmem:[%s766_s1 + $0x10] sm:$0xff]   ;;  %v64_v11 = vshrl.u32 %v63_v7, 7 }
   0x3   :  { %598 = vmatpush3.bf16.msra.mxu0 %v621_v1  ;;  %v626_v9 = vld [vmem:[%s766_s1 + $0x58] sm:$0xff]   ;;  %v62_v10 = vunpack.c.0.s8 %v61_v6  ;;  %v628_v13 = vld [vmem:[%s766_s1 + $0x60] sm:$0xff]   ;;  %v630_v16 = vld [vmem:[%s766_s1 + $0x68] sm:$0xff]  }
   0x4   :  { %599 = vmatprep.subr.bf16.mxu0 %v622_v2  ;;  %v627_v12 = vld [vmem:[%s766_s1 + $0x18] sm:$0xff]   ;;  %v629_v15 = vld [vmem:[%s766_s1 + $0x20] sm:$0xff]   ;;  %v575_v18 = vld.sshfl [vmem:[%s767_s0 + $0x8] sm:$0x5f pattern:$0x75316420] }
   0x5   :  { %v685_v14 = vsub.s32 %v62_v10, %v64_v11  ;;  %v574_v17 = vld.sshfl [vmem:[%s767_s0] sm:$0x5f pattern:$0x75316420]  ;;  %v82_v21 = vcombine.high %v575_v18, %v575_v18  ;;  %v631_v23 = vld [vmem:[%s766_s1 + $0x28] sm:$0xff]   ;;  %v632_v26 = vld [vmem:[%s766_s1 + $0x70] sm:$0xff]  }
   0x6   :  { %v59_v19 = vcombine.high %v574_v17, %v574_v17  ;;  %v633_v34 = vld [vmem:[%s766_s1 + $0x30] sm:$0xff]   ;;  %v634_v35 = vld [vmem:[%s766_s1 + $0x78] sm:$0xff]   ;;  %v49_v51 = vld [vmem:[%s768_s2] sm:$0x1f] }
   0x7   :  { %600 = vmatpush3.bf16.msra.mxu0 %v623_v3  ;;  %v66_v20 = vrot.slane %v574_v17, %v685_v14  ;;  %v89_v22 = vrot.slane %v575_v18, %v685_v14  ;;  %v96_v27 = vrot.slane %v82_v21, %v685_v14  ;;  %v635_v41 = vld [vmem:[%s766_s1 + $0x38] sm:$0xff]   ;;  %v109_v52 = vcombine.high %v49_v51, %v49_v51 }
   0x8   :  { %601 = vmatprep.subr.bf16.mxu0 %v624_v4  ;;  %v73_v24 = vrot.slane %v59_v19, %v685_v14  ;;  %v116_v53 = vrot.slane %v49_v51, %v685_v14 }
   0x9   :  { %v74_v25 = vcombine.high %v66_v20, %v66_v20  ;;  %v97_v28 = vcombine.high %v89_v22, %v89_v22  ;;  %v104_v29 = vunpack.i.h.s16 %v89_v22  ;;  %v106_v32 = vunpack.i.h.s16 %v96_v27 }
   0xa   :  { %v153_v31 = vcombine.low %v66_v20, %v73_v24  ;;  %v123_v54 = vrot.slane %v109_v52, %v685_v14  ;;  %v124_v55 = vcombine.high %v116_v53, %v116_v53  ;;  %v131_v56 = vrot.slane %v116_v53, %v685_v14 }
   0xb   :  { %602 = vmatpush3.bf16.msra.mxu0 %v625_v8  ;;  %v576_v30 = vpack.i.b16 %v89_v22, %v74_v25  ;;  %v577_v33 = vpack.i.b16 %v96_v27, %v104_v29  ;;  %v578_v36 = vpack.i.b16 %v97_v28, %v106_v32 }
   0xc   :  { %603 = vmatprep.subr.bf16.mxu0 %v626_v9  ;;  %v161_v38 = vrot.slane %v153_v31, %v685_v14  ;;  %v138_v57 = vrot.slane %v123_v54, %v685_v14  ;;  %v145_v58 = vrot.slane %v124_v55, %v685_v14  ;;  %v146_v59 = vcombine.high %v131_v56, %v131_v56 }
   0xd   :  { %v154_v37 = vcombine.low %v576_v30, %v577_v33  ;;  %v175_v40 = vrot.slane %v578_v36, %v685_v14 }
   0xe   :  { %v307_v60 = vcombine.low %v131_v56, %v145_v58  ;;  %v595_v61 = vcombine.high %v131_v56, %v145_v58  ;;  %v309_v62 = vcombine.low %v138_v57, %v131_v56  ;;  %v310_v63 = vcombine.low %v145_v58, %v146_v59 }
   0xf   :  { %604 = vmatpush3.bf16.msra.mxu0 %v627_v12  ;;  %v168_v39 = vrot.slane %v154_v37, %v685_v14  ;;  %v178_v43 = vcombine.high %v175_v40, %v175_v40  ;;  %v199_v45 = vrot.slane %v175_v40, %v685_v14  ;;  %v147_v4 = vcombine.high %v145_v58, %v145_v58 }
  0x10   :  { %605 = vmatprep.subr.bf16.mxu0 %v628_v13  ;;  %v317_v0 = vrot.slane %v307_v60, %v685_v14  ;;  %v324_v1 = vrot.slane %v595_v61, %v685_v14  ;;  %v331_v2 = vrot.slane %v309_v62, %v685_v14  ;;  %v338_v3 = vrot.slane %v310_v63, %v685_v14 }
  0x11   :  { %v177_v42 = vcombine.high %v161_v38, %v168_v39  ;;  %v176_v44 = vcombine.low %v161_v38, %v168_v39  ;;  %v206_v47 = vrot.slane %v178_v43, %v685_v14  ;;  %v356_v7 = vcombine.low %v147_v4, %v138_v57 }
  0x12   :  { %v339_v5 = vcombine.low %v317_v0, %v324_v1  ;;  %v340_v6 = vcombine.low %v331_v2, %v338_v3 }
  0x13   :  { %606 = vmatpush3.bf16.msra.mxu0 %v629_v15  ;;  %v192_v46 = vrot.slane %v177_v42, %v685_v14  ;;  %v185_v48 = vrot.slane %v176_v44, %v685_v14  ;;  %v363_v10 = vrot.slane %v356_v7, %v685_v14 }
  0x14   :  { %607 = vmatprep.subr.bf16.mxu0 %v630_v16  ;;  %v347_v8 = vrot.slane %v339_v5, %v685_v14  ;;  %v354_v9 = vrot.slane %v340_v6, %v685_v14 }
  0x15   :  { %v208_v49 = vcombine.low %v192_v46, %v206_v47  ;;  %v207_v50 = vcombine.low %v185_v48, %v199_v45  ;;  %v370_v17 = vrot.slane %v363_v10, %v685_v14 }
  0x16   :  { %v355_v12 = vcombine.low %v347_v8, %v354_v9 }
  0x17   :  { %608 = vmatpush3.bf16.msra.mxu0 %v631_v23  ;;  %405 = vmatprep.mubr.bf16.mxu0 %v208_v49 }
  0x18   :  { %609 = vmatprep.subr.bf16.mxu0 %v632_v26 }
  0x1b   :  { %610 = vmatpush3.bf16.msra.mxu0 %v633_v34 }
  0x1c   :  { %611 = vmatprep.subr.bf16.mxu0 %v634_v35 }
  0x1f   :  { %612 = vmatpush3.bf16.msra.mxu0 %v635_v41 }
  0x22   :  { %406 = vmatmul.mubr.bf16.vlgmr.msra.gmra.mrb[0].mxu0 %v207_v50 }
  0xf5   :  { %v613_v11 = vpop.f32.mrb[0].mxu0 }
  0xf6   :  { %v614_v13 = vpop.f32.mrb[1].mxu0 }
  0xf7   :  { %v615_v15 = vadd.f32 %v614_v13, %v613_v11  ;;  %v616_v16 = vpop.f32.mrb[2].mxu0 }
  0xf8   :  { %v617_v18 = vpop.f32.mrb[3].mxu0 }
  0xf9   :  { %v408_v19 = vadd.f32 %v615_v15, %v355_v12  ;;  %v618_v20 = vadd.f32 %v617_v18, %v616_v16 }
  0xfb   :  { %v416_v21 = vcombine.high %v408_v19, %v408_v19  ;;  %v423_v22 = vrot.slane %v408_v19, %v685_v14  ;;  %v411_v23 = vadd.f32 %v618_v20, %v370_v17 }
  0xfd   :  { %v430_v24 = vrot.slane %v416_v21, %v685_v14  ;;  %v431_v25 = vcombine.high %v423_v22, %v423_v22  ;;  %v471_v26 = vrot.slane %v411_v23, %v685_v14  ;;  %v439_v27 = vrot.slane %v423_v22, %v685_v14 }
  0xff   :  { %v432_v28 = vcombine.high %v430_v24, %v430_v24  ;;  %v446_v29 = vrot.slane %v430_v24, %v685_v14  ;;  %v453_v30 = vrot.slane %v431_v25, %v685_v14  ;;  %v472_v31 = vcombine.high %v471_v26, %v471_v26 }
 0x100   :  { %v479_v37 = vrot.slane %v471_v26, %v685_v14 }
 0x101   :  { %v460_v32 = vrot.slane %v432_v28, %v685_v14  ;;  %v462_v33 = vcombine.high %v446_v29, %v446_v29  ;;  %v487_v34 = vcombine.low %v439_v27, %v453_v30  ;;  %v596_v35 = vcombine.high %v439_v27, %v453_v30 }
 0x102   :  { %v509_v36 = vrot.slane %v446_v29, %v685_v14  ;;  %v486_v38 = vrot.slane %v472_v31, %v685_v14 }
 0x103   :  { %v495_v39 = vrot.slane %v487_v34, %v685_v14  ;;  %v502_v40 = vrot.slane %v596_v35, %v685_v14  ;;  %v526_v41 = vcombine.low %v460_v32, %v462_v33  ;;  %v464_v42 = vcombine.high %v460_v32, %v460_v32 }
 0x104   :  { %v524_v45 = vrot.slane %v509_v36, %v685_v14  ;;  %v548_v49 = vrot.slane %v486_v38, %v685_v14 }
 0x105   :  { %v510_v43 = vcombine.low %v495_v39, %v502_v40  ;;  %v527_v44 = vcombine.low %v464_v42, %v479_v37  ;;  %v534_v47 = vrot.slane %v526_v41, %v685_v14 }
 0x106   :  { %v563_v53 = vrot.slane %v548_v49, %v685_v14 }
 0x107   :  { %v517_v46 = vrot.slane %v510_v43, %v685_v14  ;;  %v541_v48 = vrot.slane %v527_v44, %v685_v14 }
 0x109   :  { %v525_v50 = vcombine.low %v517_v46, %v524_v45  ;;  %v549_v51 = vcombine.low %v534_v47, %v541_v48 }
 0x10b   :  { %568 = vst.msk [vmem:[%s769_s3] sm:$0x1f] %vm567_vm0, %v525_v50  ;;  %v556_v52 = vrot.slane %v549_v51, %v685_v14 }
 0x10d   :  { %v564_v54 = vcombine.low %v556_v52, %v563_v53 }
 0x10f   :  { %569 = vst.msk [vmem:[%s769_s3 + $0x8] sm:$0x1f] %vm567_vm0, %v564_v54 }

</bundles_post_ra>
